<compile_context>
chip_gen: v5e
topology: v5e:2x2
jax: 0.10.0
libtpu: 0.0.40
codegen_flags: <defaults>
</compile_context>

<pallas_src>
import functools

import jax
import jax.numpy as jnp
from jax import lax
from jax.experimental import pallas as pl
from jax.experimental.pallas import tpu as pltpu


def _round_up(x, m):
    return ((x + m - 1) // m) * m


# ----------------------------------------------------------------------------
# Pallas kernels
# ----------------------------------------------------------------------------

def _gn_conv_relu_kernel(x_ref, mask_ref, gmat_ref, gamma_ref, beta_ref, w_ref,
                         o_ref, *, wp, ks, groups, inv_count, eps, use_norm,
                         use_activation):
    # x_ref block: (1, Cin, Mpad) -- one zero-padded sample, NCHW flattened over Hp*Wp.
    x = x_ref[0].astype(jnp.float32)                          # (Cin, Mpad), f32 math
    mpad = x.shape[1]
    if use_norm:
        mask = mask_ref[...]                                  # (1, Mpad); 1 on valid pixels
        xm = x * mask
        if groups == 1:
            mu = jnp.sum(xm) * inv_count                      # scalar group mean
            diff = (x - mu) * mask
            var = jnp.sum(diff * diff) * inv_count            # biased variance
        else:
            s1 = jnp.sum(xm, axis=1, keepdims=True)           # (Cin, 1)
            mu = jnp.dot(gmat_ref[...], s1, preferred_element_type=jnp.float32)
            diff = (x - mu) * mask
            s2 = jnp.sum(diff * diff, axis=1, keepdims=True)
            var = jnp.dot(gmat_ref[...], s2, preferred_element_type=jnp.float32)
        inv = lax.rsqrt(var + eps)
        # normalize + per-channel affine, then re-zero the padding ring
        # (reference applies zero-padding AFTER the norm/affine).
        xn = ((x - mu) * inv * gamma_ref[...] + beta_ref[...]) * mask
    else:
        xn = x                                                # pad ring is already zero

    cout = w_ref.shape[1]
    acc = jnp.zeros((cout, mpad), jnp.float32)
    for k in range(ks * ks):                                  # unrolled conv taps
        d = (k // ks) * wp + (k % ks)                         # flat shift for tap (kh, kw)
        shifted = pltpu.roll(xn, mpad - d, axis=1) if d else xn
        # bf16 only at the MXU boundary, f32 accumulation.
        acc = acc + jnp.dot(w_ref[k], shifted.astype(jnp.bfloat16),
                            preferred_element_type=jnp.float32)
    if use_activation:
        acc = jnp.maximum(acc, 0.0)
    o_ref[0] = acc.astype(o_ref.dtype)


def _ln_matmul_relu_kernel(x_ref, gamma_ref, beta_ref, w_ref, o_ref, *, eps,
                           use_norm, use_activation):
    x = x_ref[...].astype(jnp.float32)                        # (tb, Din), f32 norm math
    if use_norm:
        mu = jnp.mean(x, axis=-1, keepdims=True)
        var = jnp.mean(jnp.square(x - mu), axis=-1, keepdims=True)
        x = (x - mu) * lax.rsqrt(var + eps) * gamma_ref[...] + beta_ref[...]
    acc = jnp.dot(x.astype(jnp.bfloat16), w_ref[...],         # bf16 MXU, f32 accumulate
                  preferred_element_type=jnp.float32)
    if use_activation:
        acc = jnp.maximum(acc, 0.0)
    o_ref[...] = acc.astype(o_ref.dtype)


# ----------------------------------------------------------------------------
# pallas_call wrappers
# ----------------------------------------------------------------------------

def gn_conv_relu_pallas(x_nchw, gamma, beta, groups, w_k, ks, padding, eps,
                        use_norm, use_activation):
    """Fused [GroupNorm] -> Conv2d(ks, stride=1, pad, no bias) -> [ReLU] (NCHW)."""
    N, C, H, W = x_nchw.shape
    p = int(padding)
    Hp, Wp = H + 2 * p, W + 2 * p
    Ho, Wo = Hp - ks + 1, Wp - ks + 1
    Cout = w_k.shape[1]
    M = Hp * Wp
    Mpad = _round_up(M, 128)                                  # lane-dense acc / output

    xp = jnp.pad(x_nchw, ((0, 0), (0, 0), (p, p), (p, p))) if p else x_nchw
    x_flat = xp.reshape(N, C, M)
    if Mpad != M:
        x_flat = jnp.pad(x_flat, ((0, 0), (0, 0), (0, Mpad - M)))

    # validity mask over flattened padded spatial positions (excludes pad ring + tail)
    midx = jnp.arange(Mpad, dtype=jnp.int32)
    hh, ww = midx // Wp, midx % Wp
    mask = ((hh >= p) & (hh < p + H) & (ww >= p) & (ww < p + W))
    mask = mask.astype(jnp.float32).reshape(1, Mpad)

    groups = int(groups) if groups else 1
    cpg = C // groups
    cidx = jnp.arange(C, dtype=jnp.int32) // cpg
    gmat = (cidx[:, None] == cidx[None, :]).astype(jnp.float32) / float(cpg * H * W)
    gamma2 = jnp.asarray(gamma, jnp.float32).reshape(C, 1)
    beta2 = jnp.asarray(beta, jnp.float32).reshape(C, 1)

    kernel = functools.partial(
        _gn_conv_relu_kernel, wp=Wp, ks=ks, groups=groups,
        inv_count=1.0 / float(cpg * H * W), eps=eps,
        use_norm=use_norm, use_activation=use_activation)

    out = pl.pallas_call(
        kernel,
        out_shape=jax.ShapeDtypeStruct((N, Cout, Mpad), x_nchw.dtype),
        grid=(N,),
        in_specs=[
            pl.BlockSpec((1, C, Mpad), lambda n: (n, 0, 0)),
            pl.BlockSpec((1, Mpad), lambda n: (0, 0)),
            pl.BlockSpec((C, C), lambda n: (0, 0)),
            pl.BlockSpec((C, 1), lambda n: (0, 0)),
            pl.BlockSpec((C, 1), lambda n: (0, 0)),
            pl.BlockSpec((ks * ks, Cout, C), lambda n: (0, 0, 0)),
        ],
        out_specs=pl.BlockSpec((1, Cout, Mpad), lambda n: (n, 0, 0)),
        compiler_params=pltpu.CompilerParams(
            dimension_semantics=("parallel",),
            vmem_limit_bytes=48 * 1024 * 1024),
    )(x_flat, mask, gmat, gamma2, beta2, w_k)

    # drop the lane-pad tail, un-flatten, keep the valid (Ho, Wo) window -> NCHW
    return out[:, :, :M].reshape(N, Cout, Hp, Wp)[:, :, :Ho, :Wo]


def ln_linear_relu_pallas(x, gamma, beta, w_bf16, dout, use_norm, use_activation,
                          eps, tb=128, tn=128):
    """Fused [LayerNorm] -> Linear(no bias) -> [ReLU]; w_bf16 is (Din, Dout_pad) bf16."""
    B, Din = x.shape
    Dout_pad = w_bf16.shape[1]
    Bp = _round_up(B, tb)
    if Bp != B:
        x = jnp.pad(x, ((0, Bp - B), (0, 0)))
    gamma2 = jnp.asarray(gamma, jnp.float32).reshape(1, Din)
    beta2 = jnp.asarray(beta, jnp.float32).reshape(1, Din)

    kernel = functools.partial(_ln_matmul_relu_kernel, eps=eps, use_norm=use_norm,
                               use_activation=use_activation)
    out = pl.pallas_call(
        kernel,
        out_shape=jax.ShapeDtypeStruct((Bp, Dout_pad), x.dtype),
        grid=(Bp // tb, Dout_pad // tn),
        in_specs=[
            pl.BlockSpec((tb, Din), lambda i, j: (i, 0)),
            pl.BlockSpec((1, Din), lambda i, j: (0, 0)),
            pl.BlockSpec((1, Din), lambda i, j: (0, 0)),
            pl.BlockSpec((Din, tn), lambda i, j: (0, j)),
        ],
        out_specs=pl.BlockSpec((tb, tn), lambda i, j: (i, j)),
        compiler_params=pltpu.CompilerParams(
            dimension_semantics=("parallel", "parallel"),
            vmem_limit_bytes=48 * 1024 * 1024),
    )(x, gamma2, beta2, w_bf16)
    return out[:B, :dout]


# ----------------------------------------------------------------------------
# Module port
# ----------------------------------------------------------------------------

class FanInInitReLULayerPallas:
    """JAX/Pallas port of FanInInitReLULayer (norm -> layer -> ReLU)."""

    def __init__(self, inchan, outchan, *layer_args, layer_type="conv",
                 init_scale=1.0, batch_norm=False, group_norm_groups=None,
                 layer_norm=False, use_activation=True, key=None, **layer_kwargs):
        # TODO(synk): conv3d and BatchNorm2d (running-stats) paths are not ported.
        assert layer_type in ("conv", "linear")
        assert not batch_norm
        self.inchan, self.outchan = inchan, outchan
        self.layer_type = layer_type
        self.use_activation = use_activation
        self.eps = 1e-5
        self.groups = int(group_norm_groups) if group_norm_groups is not None else 1

        if group_norm_groups is not None:
            self.norm_type = "group"
        elif layer_norm:
            self.norm_type = "layer"
        else:
            self.norm_type = None
        # PyTorch GroupNorm / LayerNorm default affine init: weight=1, bias=0
        self.gamma = jnp.ones((inchan,), jnp.float32)
        self.beta = jnp.zeros((inchan,), jnp.float32)

        if layer_type == "conv":
            assert not layer_norm  # LayerNorm-on-NCHW not meaningful / not ported
            ks = int(layer_args[0] if layer_args else layer_kwargs.get("kernel_size", 3))
            self.kernel_size = ks
            self.stride = int(layer_kwargs.get("stride", 1))
            self.padding = int(layer_kwargs.get("padding", 0))
            w = jax.random.normal(key, (outchan, inchan, ks, ks), jnp.float32)
            fan = jnp.sqrt(jnp.sum(w * w, axis=(1, 2, 3), keepdims=True))
            # fan-in init: w *= init_scale / ||w||_2 over all non-output dims
            self.w = w * (init_scale / fan)                       # f32, OIHW (reference)
            # per-tap weights (ks*ks, Cout, Cin), pre-cast to bf16 for the MXU
            self.w_k = (jnp.transpose(self.w, (2, 3, 0, 1))
                        .reshape(ks * ks, outchan, inchan).astype(jnp.bfloat16))
        else:
            w = jax.random.normal(key, (outchan, inchan), jnp.float32)
            fan = jnp.sqrt(jnp.sum(w * w, axis=1, keepdims=True))
            self.w = w * (init_scale / fan)                       # f32 (reference)
            dpad = _round_up(outchan, 128)                        # lane-dense output tiles
            wt = self.w.T
            if dpad != outchan:
                wt = jnp.pad(wt, ((0, 0), (0, dpad - outchan)))
            self.w_t = wt.astype(jnp.bfloat16)                    # (Din, Dout_pad) bf16
        # bias exists only when norm is None and is zeroed by __init__ -> omitted.

    def __call__(self, x):
        if self.layer_type == "conv":
            if self.stride != 1:
                # TODO(synk): stride>1 conv (unused by VPT's Impala CNN) falls back to XLA.
                return self._conv_fallback(x)
            return gn_conv_relu_pallas(
                x, self.gamma, self.beta, self.groups, self.w_k, self.kernel_size,
                self.padding, self.eps, self.norm_type == "group",
                self.use_activation)
        return ln_linear_relu_pallas(
            x, self.gamma, self.beta, self.w_t, self.outchan,
            self.norm_type == "layer", self.use_activation, self.eps)

    def _conv_fallback(self, x):
        N, C, H, W = x.shape
        if self.norm_type == "group":
            xg = x.reshape(N, self.groups, -1)
            mu = xg.mean(-1, keepdims=True)
            var = jnp.square(xg - mu).mean(-1, keepdims=True)
            x = ((xg - mu) * lax.rsqrt(var + self.eps)).reshape(N, C, H, W)
            x = x * self.gamma.reshape(1, C, 1, 1) + self.beta.reshape(1, C, 1, 1)
        y = lax.conv_general_dilated(x, self.w, (self.stride, self.stride),
                                     [(self.padding, self.padding)] * 2,
                                     dimension_numbers=("NCHW", "OIHW", "NCHW"))
        return jnp.maximum(y, 0.0) if self.use_activation else y


# ----------------------------------------------------------------------------
# Pure-JAX references for verification
# ----------------------------------------------------------------------------

def reference_conv(x, gamma, beta, G, w, use_act, stride, padding, eps=1e-5):
    N, C, H, W = x.shape
    xg = x.reshape(N, G, -1)
    mu = xg.mean(-1, keepdims=True)
    var = jnp.square(xg - mu).mean(-1, keepdims=True)
    xn = ((xg - mu) / jnp.sqrt(var + eps)).reshape(N, C, H, W)
    xn = xn * gamma.reshape(1, C, 1, 1) + beta.reshape(1, C, 1, 1)
    y = lax.conv_general_dilated(xn, w, (stride, stride),
                                 [(padding, padding)] * 2,
                                 dimension_numbers=("NCHW", "OIHW", "NCHW"))
    return jnp.maximum(y, 0.0) if use_act else y


def reference_linear(x, gamma, beta, w, use_act, eps=1e-5):
    mu = x.mean(-1, keepdims=True)
    var = jnp.square(x - mu).mean(-1, keepdims=True)
    xn = (x - mu) / jnp.sqrt(var + eps) * gamma[None, :] + beta[None, :]
    y = xn @ w.T
    return jnp.maximum(y, 0.0) if use_act else y


if __name__ == "__main__":
    key = jax.random.PRNGKey(0)
    k_wc, k_xc, k_wl, k_xl, k_g1, k_g2, k_g3, k_g4 = jax.random.split(key, 8)

    # --- conv path: GroupNorm(1) -> Conv2d(4 -> 8, k=3, p=1, no bias) -> ReLU ---
    conv_layer = FanInInitReLULayerPallas(
        4, 8, 3, layer_type="conv", padding=1, group_norm_groups=1,
        init_scale=1.4, key=k_wc)
    # non-trivial affine params to exercise the gamma/beta + pad-after-norm path
    conv_layer.gamma = 1.0 + 0.1 * jax.random.normal(k_g1, (4,), jnp.float32)
    conv_layer.beta = 0.1 * jax.random.normal(k_g2, (4,), jnp.float32)
    x_conv = jax.random.normal(k_xc, (2, 4, 16, 16), jnp.float32)
    y_conv = jax.block_until_ready(conv_layer(x_conv))
    y_conv_ref = reference_conv(x_conv, conv_layer.gamma, conv_layer.beta, 1,
                                conv_layer.w, True, 1, 1)
    assert y_conv.shape == (2, 8, 16, 16)
    assert jnp.max(jnp.abs(y_conv - y_conv_ref)) < 5e-2   # bf16 MXU operands

    # --- linear path: LayerNorm(32) -> Linear(32 -> 32, no bias) -> ReLU ---
    lin_layer = FanInInitReLULayerPallas(
        32, 32, layer_type="linear", layer_norm=True, init_scale=1.0, key=k_wl)
    lin_layer.gamma = 1.0 + 0.1 * jax.random.normal(k_g3, (32,), jnp.float32)
    lin_layer.beta = 0.1 * jax.random.normal(k_g4, (32,), jnp.float32)
    x_lin = jax.random.normal(k_xl, (8, 32), jnp.float32)
    y_lin = jax.block_until_ready(lin_layer(x_lin))
    y_lin_ref = reference_linear(x_lin, lin_layer.gamma, lin_layer.beta,
                                 lin_layer.w, True)
    assert y_lin.shape == (8, 32)
    assert jnp.max(jnp.abs(y_lin - y_lin_ref)) < 5e-2

    print("KERNEL_OK")
</pallas_src>

<mosaic_0001>
module attributes {stable_mosaic.version = 11 : i64} {
  func.func @_gn_conv_relu_kernel(%arg0: i32, %arg1: memref<1x4x384xf32, #tpu.memory_space<vmem>>, %arg2: memref<1x384xf32, #tpu.memory_space<vmem>>, %arg3: memref<4x4xf32, #tpu.memory_space<vmem>>, %arg4: memref<4x1xf32, #tpu.memory_space<vmem>>, %arg5: memref<4x1xf32, #tpu.memory_space<vmem>>, %arg6: memref<9x8x4xbf16, #tpu.memory_space<vmem>>, %arg7: memref<1x8x384xf32, #tpu.memory_space<vmem>>) attributes {dimension_semantics = [#tpu.dimension_semantics<parallel>], iteration_bounds = array<i64: 2>, scalar_prefetch = 0 : i64, scratch_operands = 0 : i64, tpu.core_type = #tpu.core_type<tc>, window_params = [{transform_indices = @transform_0, window_bounds = array<i64: 1, 4, 384>}, {pipeline_mode = #tpu.pipeline_mode<synchronous>, transform_indices = @transform_1, window_bounds = array<i64: 1, 384>}, {pipeline_mode = #tpu.pipeline_mode<synchronous>, transform_indices = @transform_2, window_bounds = array<i64: 4, 4>}, {pipeline_mode = #tpu.pipeline_mode<synchronous>, transform_indices = @transform_3, window_bounds = array<i64: 4, 1>}, {pipeline_mode = #tpu.pipeline_mode<synchronous>, transform_indices = @transform_4, window_bounds = array<i64: 4, 1>}, {pipeline_mode = #tpu.pipeline_mode<synchronous>, transform_indices = @transform_5, window_bounds = array<i64: 9, 8, 4>}, {transform_indices = @transform_6, window_bounds = array<i64: 1, 8, 384>}]} {
    %c0 = arith.constant 0 : index
    %c0_0 = arith.constant 0 : index
    %c0_1 = arith.constant 0 : index
    %0 = vector.load %arg1[%c0, %c0_0, %c0_1] : memref<1x4x384xf32, #tpu.memory_space<vmem>>, vector<1x4x384xf32>
    %1 = vector.shape_cast %0 : vector<1x4x384xf32> to vector<4x384xf32>
    %c0_2 = arith.constant 0 : index
    %c0_3 = arith.constant 0 : index
    %2 = vector.load %arg2[%c0_2, %c0_3] : memref<1x384xf32, #tpu.memory_space<vmem>>, vector<1x384xf32>
    %3 = vector.broadcast %2 : vector<1x384xf32> to vector<4x384xf32>
    %4 = arith.mulf %1, %3 : vector<4x384xf32>
    %5 = vector.shape_cast %4 : vector<4x384xf32> to vector<1x4x384xf32>
    %cst = arith.constant dense<0.000000e+00> : vector<1xf32>
    %6 = vector.multi_reduction <add>, %5, %cst [1, 2] : vector<1x4x384xf32> to vector<1xf32>
    %7 = vector.shape_cast %6 : vector<1xf32> to vector<1x1x1xf32>
    %8 = vector.extract %7[0, 0, 0] : f32 from vector<1x1x1xf32>
    %cst_4 = arith.constant 9.765625E-4 : f32
    %9 = arith.mulf %8, %cst_4 : f32
    %10 = vector.broadcast %9 : f32 to vector<4x384xf32>
    %11 = arith.subf %1, %10 : vector<4x384xf32>
    %12 = vector.broadcast %2 : vector<1x384xf32> to vector<4x384xf32>
    %13 = arith.mulf %11, %12 : vector<4x384xf32>
    %14 = arith.mulf %13, %13 : vector<4x384xf32>
    %15 = vector.shape_cast %14 : vector<4x384xf32> to vector<1x4x384xf32>
    %cst_5 = arith.constant dense<0.000000e+00> : vector<1xf32>
    %16 = vector.multi_reduction <add>, %15, %cst_5 [1, 2] : vector<1x4x384xf32> to vector<1xf32>
    %17 = vector.shape_cast %16 : vector<1xf32> to vector<1x1x1xf32>
    %18 = vector.extract %17[0, 0, 0] : f32 from vector<1x1x1xf32>
    %cst_6 = arith.constant 9.765625E-4 : f32
    %19 = arith.mulf %18, %cst_6 : f32
    %cst_7 = arith.constant 9.99999974E-6 : f32
    %20 = arith.addf %19, %cst_7 : f32
    %21 = math.rsqrt %20 : f32
    %22 = vector.broadcast %9 : f32 to vector<4x384xf32>
    %23 = arith.subf %1, %22 : vector<4x384xf32>
    %24 = vector.broadcast %21 : f32 to vector<4x384xf32>
    %25 = arith.mulf %23, %24 : vector<4x384xf32>
    %c0_8 = arith.constant 0 : index
    %c0_9 = arith.constant 0 : index
    %26 = vector.load %arg4[%c0_8, %c0_9] : memref<4x1xf32, #tpu.memory_space<vmem>>, vector<4x1xf32>
    %27 = vector.broadcast %26 : vector<4x1xf32> to vector<4x384xf32>
    %28 = arith.mulf %25, %27 : vector<4x384xf32>
    %c0_10 = arith.constant 0 : index
    %c0_11 = arith.constant 0 : index
    %29 = vector.load %arg5[%c0_10, %c0_11] : memref<4x1xf32, #tpu.memory_space<vmem>>, vector<4x1xf32>
    %30 = vector.broadcast %29 : vector<4x1xf32> to vector<4x384xf32>
    %31 = arith.addf %28, %30 : vector<4x384xf32>
    %32 = vector.broadcast %2 : vector<1x384xf32> to vector<4x384xf32>
    %33 = arith.mulf %31, %32 : vector<4x384xf32>
    %cst_12 = arith.constant 0.000000e+00 : f32
    %34 = vector.broadcast %cst_12 : f32 to vector<8x384xf32>
    %c0_13 = arith.constant 0 : index
    %c0_14 = arith.constant 0 : index
    %c0_15 = arith.constant 0 : index
    %35 = vector.load %arg6[%c0_13, %c0_14, %c0_15] : memref<9x8x4xbf16, #tpu.memory_space<vmem>>, vector<1x8x4xbf16>
    %36 = vector.shape_cast %35 : vector<1x8x4xbf16> to vector<8x4xbf16>
    %37 = arith.truncf %33 : vector<4x384xf32> to vector<4x384xbf16>
    %cst_16 = arith.constant dense<0.000000e+00> : vector<8x384xf32>
    %38 = tpu.matmul %36, %37, %cst_16 {dimension_numbers = #tpu.dot_dimension_numbers<[1], [0], [0], [1], [0, 0, 1, 1], [], []>} : vector<8x4xbf16>, vector<4x384xbf16>, vector<8x384xf32> -> vector<8x384xf32>
    %39 = arith.addf %34, %38 : vector<8x384xf32>
    %c383_i32 = arith.constant 383 : i32
    %40 = tpu.dynamic_rotate %33 by %c383_i32 dim 1 : vector<4x384xf32>, i32 -> vector<4x384xf32>
    %c1 = arith.constant 1 : index
    %c0_17 = arith.constant 0 : index
    %c0_18 = arith.constant 0 : index
    %41 = vector.load %arg6[%c1, %c0_17, %c0_18] : memref<9x8x4xbf16, #tpu.memory_space<vmem>>, vector<1x8x4xbf16>
    %42 = vector.shape_cast %41 : vector<1x8x4xbf16> to vector<8x4xbf16>
    %43 = arith.truncf %40 : vector<4x384xf32> to vector<4x384xbf16>
    %cst_19 = arith.constant dense<0.000000e+00> : vector<8x384xf32>
    %44 = tpu.matmul %42, %43, %cst_19 {dimension_numbers = #tpu.dot_dimension_numbers<[1], [0], [0], [1], [0, 0, 1, 1], [], []>} : vector<8x4xbf16>, vector<4x384xbf16>, vector<8x384xf32> -> vector<8x384xf32>
    %45 = arith.addf %39, %44 : vector<8x384xf32>
    %c382_i32 = arith.constant 382 : i32
    %46 = tpu.dynamic_rotate %33 by %c382_i32 dim 1 : vector<4x384xf32>, i32 -> vector<4x384xf32>
    %c2 = arith.constant 2 : index
    %c0_20 = arith.constant 0 : index
    %c0_21 = arith.constant 0 : index
    %47 = vector.load %arg6[%c2, %c0_20, %c0_21] : memref<9x8x4xbf16, #tpu.memory_space<vmem>>, vector<1x8x4xbf16>
    %48 = vector.shape_cast %47 : vector<1x8x4xbf16> to vector<8x4xbf16>
    %49 = arith.truncf %46 : vector<4x384xf32> to vector<4x384xbf16>
    %cst_22 = arith.constant dense<0.000000e+00> : vector<8x384xf32>
    %50 = tpu.matmul %48, %49, %cst_22 {dimension_numbers = #tpu.dot_dimension_numbers<[1], [0], [0], [1], [0, 0, 1, 1], [], []>} : vector<8x4xbf16>, vector<4x384xbf16>, vector<8x384xf32> -> vector<8x384xf32>
    %51 = arith.addf %45, %50 : vector<8x384xf32>
    %c366_i32 = arith.constant 366 : i32
    %52 = tpu.dynamic_rotate %33 by %c366_i32 dim 1 : vector<4x384xf32>, i32 -> vector<4x384xf32>
    %c3 = arith.constant 3 : index
    %c0_23 = arith.constant 0 : index
    %c0_24 = arith.constant 0 : index
    %53 = vector.load %arg6[%c3, %c0_23, %c0_24] : memref<9x8x4xbf16, #tpu.memory_space<vmem>>, vector<1x8x4xbf16>
    %54 = vector.shape_cast %53 : vector<1x8x4xbf16> to vector<8x4xbf16>
    %55 = arith.truncf %52 : vector<4x384xf32> to vector<4x384xbf16>
    %cst_25 = arith.constant dense<0.000000e+00> : vector<8x384xf32>
    %56 = tpu.matmul %54, %55, %cst_25 {dimension_numbers = #tpu.dot_dimension_numbers<[1], [0], [0], [1], [0, 0, 1, 1], [], []>} : vector<8x4xbf16>, vector<4x384xbf16>, vector<8x384xf32> -> vector<8x384xf32>
    %57 = arith.addf %51, %56 : vector<8x384xf32>
    %c365_i32 = arith.constant 365 : i32
    %58 = tpu.dynamic_rotate %33 by %c365_i32 dim 1 : vector<4x384xf32>, i32 -> vector<4x384xf32>
    %c4 = arith.constant 4 : index
    %c0_26 = arith.constant 0 : index
    %c0_27 = arith.constant 0 : index
    %59 = vector.load %arg6[%c4, %c0_26, %c0_27] : memref<9x8x4xbf16, #tpu.memory_space<vmem>>, vector<1x8x4xbf16>
    %60 = vector.shape_cast %59 : vector<1x8x4xbf16> to vector<8x4xbf16>
    %61 = arith.truncf %58 : vector<4x384xf32> to vector<4x384xbf16>
    %cst_28 = arith.constant dense<0.000000e+00> : vector<8x384xf32>
    %62 = tpu.matmul %60, %61, %cst_28 {dimension_numbers = #tpu.dot_dimension_numbers<[1], [0], [0], [1], [0, 0, 1, 1], [], []>} : vector<8x4xbf16>, vector<4x384xbf16>, vector<8x384xf32> -> vector<8x384xf32>
    %63 = arith.addf %57, %62 : vector<8x384xf32>
    %c364_i32 = arith.constant 364 : i32
    %64 = tpu.dynamic_rotate %33 by %c364_i32 dim 1 : vector<4x384xf32>, i32 -> vector<4x384xf32>
    %c5 = arith.constant 5 : index
    %c0_29 = arith.constant 0 : index
    %c0_30 = arith.constant 0 : index
    %65 = vector.load %arg6[%c5, %c0_29, %c0_30] : memref<9x8x4xbf16, #tpu.memory_space<vmem>>, vector<1x8x4xbf16>
    %66 = vector.shape_cast %65 : vector<1x8x4xbf16> to vector<8x4xbf16>
    %67 = arith.truncf %64 : vector<4x384xf32> to vector<4x384xbf16>
    %cst_31 = arith.constant dense<0.000000e+00> : vector<8x384xf32>
    %68 = tpu.matmul %66, %67, %cst_31 {dimension_numbers = #tpu.dot_dimension_numbers<[1], [0], [0], [1], [0, 0, 1, 1], [], []>} : vector<8x4xbf16>, vector<4x384xbf16>, vector<8x384xf32> -> vector<8x384xf32>
    %69 = arith.addf %63, %68 : vector<8x384xf32>
    %c348_i32 = arith.constant 348 : i32
    %70 = tpu.dynamic_rotate %33 by %c348_i32 dim 1 : vector<4x384xf32>, i32 -> vector<4x384xf32>
    %c6 = arith.constant 6 : index
    %c0_32 = arith.constant 0 : index
    %c0_33 = arith.constant 0 : index
    %71 = vector.load %arg6[%c6, %c0_32, %c0_33] : memref<9x8x4xbf16, #tpu.memory_space<vmem>>, vector<1x8x4xbf16>
    %72 = vector.shape_cast %71 : vector<1x8x4xbf16> to vector<8x4xbf16>
    %73 = arith.truncf %70 : vector<4x384xf32> to vector<4x384xbf16>
    %cst_34 = arith.constant dense<0.000000e+00> : vector<8x384xf32>
    %74 = tpu.matmul %72, %73, %cst_34 {dimension_numbers = #tpu.dot_dimension_numbers<[1], [0], [0], [1], [0, 0, 1, 1], [], []>} : vector<8x4xbf16>, vector<4x384xbf16>, vector<8x384xf32> -> vector<8x384xf32>
    %75 = arith.addf %69, %74 : vector<8x384xf32>
    %c347_i32 = arith.constant 347 : i32
    %76 = tpu.dynamic_rotate %33 by %c347_i32 dim 1 : vector<4x384xf32>, i32 -> vector<4x384xf32>
    %c7 = arith.constant 7 : index
    %c0_35 = arith.constant 0 : index
    %c0_36 = arith.constant 0 : index
    %77 = vector.load %arg6[%c7, %c0_35, %c0_36] : memref<9x8x4xbf16, #tpu.memory_space<vmem>>, vector<1x8x4xbf16>
    %78 = vector.shape_cast %77 : vector<1x8x4xbf16> to vector<8x4xbf16>
    %79 = arith.truncf %76 : vector<4x384xf32> to vector<4x384xbf16>
    %cst_37 = arith.constant dense<0.000000e+00> : vector<8x384xf32>
    %80 = tpu.matmul %78, %79, %cst_37 {dimension_numbers = #tpu.dot_dimension_numbers<[1], [0], [0], [1], [0, 0, 1, 1], [], []>} : vector<8x4xbf16>, vector<4x384xbf16>, vector<8x384xf32> -> vector<8x384xf32>
    %81 = arith.addf %75, %80 : vector<8x384xf32>
    %c346_i32 = arith.constant 346 : i32
    %82 = tpu.dynamic_rotate %33 by %c346_i32 dim 1 : vector<4x384xf32>, i32 -> vector<4x384xf32>
    %c8 = arith.constant 8 : index
    %c0_38 = arith.constant 0 : index
    %c0_39 = arith.constant 0 : index
    %83 = vector.load %arg6[%c8, %c0_38, %c0_39] : memref<9x8x4xbf16, #tpu.memory_space<vmem>>, vector<1x8x4xbf16>
    %84 = vector.shape_cast %83 : vector<1x8x4xbf16> to vector<8x4xbf16>
    %85 = arith.truncf %82 : vector<4x384xf32> to vector<4x384xbf16>
    %cst_40 = arith.constant dense<0.000000e+00> : vector<8x384xf32>
    %86 = tpu.matmul %84, %85, %cst_40 {dimension_numbers = #tpu.dot_dimension_numbers<[1], [0], [0], [1], [0, 0, 1, 1], [], []>} : vector<8x4xbf16>, vector<4x384xbf16>, vector<8x384xf32> -> vector<8x384xf32>
    %87 = arith.addf %81, %86 : vector<8x384xf32>
    %cst_41 = arith.constant 0.000000e+00 : f32
    %88 = vector.broadcast %cst_41 : f32 to vector<8x384xf32>
    %89 = arith.maximumf %87, %88 : vector<8x384xf32>
    %c0_42 = arith.constant 0 : index
    %c0_43 = arith.constant 0 : index
    %c0_44 = arith.constant 0 : index
    %90 = vector.load %arg7[%c0_42, %c0_43, %c0_44] : memref<1x8x384xf32, #tpu.memory_space<vmem>>, vector<1x8x384xf32>
    %91 = vector.shape_cast %90 : vector<1x8x384xf32> to vector<8x384xf32>
    %92 = vector.shape_cast %89 : vector<8x384xf32> to vector<1x8x384xf32>
    tpu.vector_store %arg7[%c0_42, %c0_43, %c0_44], %92 {strides = array<i32>} : memref<1x8x384xf32, #tpu.memory_space<vmem>>, vector<1x8x384xf32>,
    return
  }
  func.func @transform_0(%arg0: i32) -> (i32, i32, i32) {
    %c0_i32 = arith.constant 0 : i32
    %c0_i32_0 = arith.constant 0 : i32
    %c0_i32_1 = arith.constant 0 : i32
    return %arg0, %c0_i32, %c0_i32_0 : i32, i32, i32
  }
  func.func @transform_1(%arg0: i32) -> (i32, i32) {
    %c0_i32 = arith.constant 0 : i32
    %c0_i32_0 = arith.constant 0 : i32
    %c0_i32_1 = arith.constant 0 : i32
    return %c0_i32, %c0_i32_0 : i32, i32
  }
  func.func @transform_2(%arg0: i32) -> (i32, i32) {
    %c0_i32 = arith.constant 0 : i32
    %c0_i32_0 = arith.constant 0 : i32
    %c0_i32_1 = arith.constant 0 : i32
    return %c0_i32, %c0_i32_0 : i32, i32
  }
  func.func @transform_3(%arg0: i32) -> (i32, i32) {
    %c0_i32 = arith.constant 0 : i32
    %c0_i32_0 = arith.constant 0 : i32
    %c0_i32_1 = arith.constant 0 : i32
    return %c0_i32, %c0_i32_0 : i32, i32
  }
  func.func @transform_4(%arg0: i32) -> (i32, i32) {
    %c0_i32 = arith.constant 0 : i32
    %c0_i32_0 = arith.constant 0 : i32
    %c0_i32_1 = arith.constant 0 : i32
    return %c0_i32, %c0_i32_0 : i32, i32
  }
  func.func @transform_5(%arg0: i32) -> (i32, i32, i32) {
    %c0_i32 = arith.constant 0 : i32
    %c0_i32_0 = arith.constant 0 : i32
    %c0_i32_1 = arith.constant 0 : i32
    %c0_i32_2 = arith.constant 0 : i32
    return %c0_i32, %c0_i32_0, %c0_i32_1 : i32, i32, i32
  }
  func.func @transform_6(%arg0: i32) -> (i32, i32, i32) {
    %c0_i32 = arith.constant 0 : i32
    %c0_i32_0 = arith.constant 0 : i32
    %c0_i32_1 = arith.constant 0 : i32
    return %arg0, %c0_i32, %c0_i32_0 : i32, i32, i32
  }
}

</mosaic_0001>

<bundles_post_ra>
// kernel: tpu_custom_call.1
= control target key start
LH: loop header
LB: loop body
LE: loop exit
PB: predicated region body
PF: predicated region fallthrough
CT: control target
= control target key end

     0   :  { %11 = vsyncpa [#allocation3], 0  ;;  %s1647_s0 = inlined_call_operand.vmem [shape: f32[2,4,384], index: 0, kind: input, shape index: {}]   ;;  %s1648_s1 = inlined_call_operand.vmem [shape: f32[1,384], index: 1, kind: input, shape index: {}]   ;;  %s1649_s2 = inlined_call_operand.vmem [shape: f32[4,4], index: 2, kind: input, shape index: {}]   ;;  %s1650_s3 = inlined_call_operand.vmem [shape: f32[4,1], index: 3, kind: input, shape index: {}]   ;;  %s1651_s4 = inlined_call_operand.vmem [shape: f32[4,1], index: 4, kind: input, shape index: {}]   ;;  %s1652_s5 = inlined_call_operand.vmem [shape: bf16[9,8,4], index: 5, kind: input, shape index: {}]   ;;  %s1653_s6 = inlined_call_operand.hbm [shape: f32[2,8,384], index: 6, kind: output, shape index: {}]  }
   0x1   :  { %13 = vsyncpa [#allocation3 + $0x1], 0  ;;  %s1393_s21 = smov 0   ;;  %s1395_s22 = smov 0  }
   0x2   :  { %s1397_s23 = smov 0   ;;  %s1399_s2 = smov 0  }
   0x3 LB: > { %s1414_s24 = sadd.s32 4294967295, %s1346_s2   ;;  %s1139_s25 = sadd.s32 4294967294, %s1346_s2   ;;  %s1346_s2 = sphi %s1399_s2, %s1659_s2   ;;  %s1342_s23 = sphi %s1397_s23, %s1658_s23   ;;  %s1338_s22 = sphi %s1395_s22, %s1657_s22   ;;  %s1334_s21 = sphi %s1393_s21, %s1656_s21  }
   0x4   : > { %s1418_s26 = sadd.s32 1, %s1346_s2   ;;  %s157_s27 = sadd.s32 1, %s1342_s23 }
   0x5   : > { %s154_s28 = ssub.s32 %s1346_s2, %s1418_s26  ;;  %p167_p0 = scmp.ne.s32.totalorder %s1342_s23, %s1338_s22 }
   0x6   : > { %p155_p1 = scmp.eq.s32.totalorder %s154_s28, 0  ;;  %p168_p2 = scmp.eq.s32.totalorder %s1414_s24, 1 }
   0x7   : > { %p173_p3 = scmp.ne.s32.totalorder %s1338_s22, %s1334_s21  ;;  %p174_p4 = scmp.eq.s32.totalorder %s1139_s25, 1 }
   0x8   : > { %s1429_s29 = scalar_select %p155_p1, %s1342_s23, %s157_s27  }
   0x9   : > { %p1431_p5 = por %p168_p2, %p167_p0  ;;  %p1435_p6 = por %p174_p4, %p173_p3 }
   0xa   : > { %p1142_p7 = scmp.ge.s32.totalorder %s1346_s2, 1  ;;  %p215_p8 = scmp.lt.s32.totalorder %s1346_s2, 3 }
   0xc   : > { %p216_p9 = pnand %p1142_p7, %p215_p8 }
   0xd   : > { %p245_p10 = scmp.lt.s32.totalorder (!%p216_p9), %s1414_s24, 1  ;;  %s1350_s9 = smov (!%p216_p9), 127  }
   0xe   : > { %219 = sbr.rel (%p216_p9) target bundleno = 870 (0x366), region = 44  ;;  %s1353_s12 = smov (!%p216_p9), 109  }
   0xf   : > { %s1354_s13 = smov (!%p216_p9), 108   ;;  %s242_s19 = sand.u32 (!%p216_p9), 1, %s1338_s22  }
  0x10   : > { %s1182_s20 = smul.u32 (!%p216_p9), 24, %s242_s19 }
  0x13   : > { %v253_v0 = vld [vmem:[%s1648_s1] sm:$0x7]  ;;  %s246_s10 = scalar_select %p245_p10, %s1414_s24, 1  ;;  %vm260_vm0 = vcmask 1043456   ;;  %v1348_v41 = vmov 0   ;;  %vm411_vm4 = vcmask 1041408  }
  0x14   : > { %v255_v1 = vperm.slane %v253_v0, 0  ;;  %v256_v2 = vperm.slane %v253_v0, 1  ;;  %v1446_v4 = vperm.slane %v253_v0, 2  ;;  %v340_v40 = vld [vmem:[%s1650_s3] sm:$0xf]  ;;  %1240 = vset.pattern.permute.xlu1 %v1348_v41  ;;  %1281 = vset.pattern.permute.xlu0 %v1348_v41  ;;  %vm407_vm5 = vcmask 31744  }
  0x15   : > { %s1183_s11 = smul.u32 12, %s246_s10  ;;  %343 = vperm.xlu1 %1240, %v340_v40   ;;  %v352_v42 = vld [vmem:[%s1651_s4] sm:$0xf]  ;;  %v1349_v59 = vmov 839922192   ;;  %s1351_s10 = smov 126  }
  0x16   : > { %v259_v3 = vrot.slane %v256_v2, 4  ;;  %v346_v60 = vunpack.c.l.s4 %v1349_v59 }
  0x17   : > { %s249_s14 = scalar_lea.vmem %s1647_s0, %s1183_s11  ;;  %s1352_s11 = smov 110  }
  0x18   : > { %v1449_v5 = vsel %vm260_vm0, %v255_v1, %v259_v3  ;;  %v251_v6 = vld [vmem:[%s249_s14] sm:$0xff]  ;;  %v252_v7 = vld [vmem:[%s249_s14 + $0x8] sm:$0xf]  ;;  %v347_v61 = vunpack.c.0.s8 %v346_v60  ;;  %s1355_s14 = smov 92  }
  0x19   : > { %v263_v8 = vmul.f32 %v1449_v5, %v251_v6  ;;  %v264_v9 = vmul.f32 %v1446_v4, %v252_v7 }
  0x1b   : > { %267 = vst [vmem:[#allocation1] ss:$2 sm:$0xff] %v263_v8 }
  0x1c   : > { %269 = vst [vmem:[#allocation1 + $0x10] ss:$2 sm:$0xff] %v264_v9 }
  0x1d   : > { %355 = vperm.xlu1 %1240, %v352_v42  }
  0x22   : > { %v270_v10 = vld.sshfl [vmem:[#allocation1] sm:$0xff pattern:$0x75316420]  ;;  %v271_v11 = vld.sshfl [vmem:[#allocation1 + $0x8] sm:$0xff pattern:$0x75316420] }
  0x23   : > { %v272_v12 = vld.sshfl [vmem:[#allocation1 + $0x10] sm:$0xff pattern:$0x75316420]  ;;  %v276_v13 = vsel %vm260_vm0, %v270_v10, 0.0  ;;  %v277_v14 = vsel %vm260_vm0, %v271_v11, 0.0 }
  0x24   : > { %v278_v15 = vadd.f32 %v277_v14, %v276_v13  ;;  %v279_v16 = vsel %vm260_vm0, %v272_v12, 0.0 }
  0x26   : > { %v280_v17 = vadd.f32 %v279_v16, %v278_v15 }
  0x28   : > { %281 = vadd.xlane.f32.xlu0 %v280_v17 }
  0x87   : > { %v344_v58 = vpop.permute.xlu1 %343 }
  0x88   : > { %v348_v0 = vperm.slane %v344_v58, %v347_v61 }
  0x8f   : > { %v356_v62 = vpop.permute.xlu1 %355 }
  0x90   : > { %v360_v3 = vperm.slane %v356_v62, %v347_v61  ;;  %v1144_v61 = vld [vmem:[%s1652_s5 + $0x4] sm:$0xf] }
  0x9b   : > { %v282_v18 = vpop.xlane.xlu0 %281 }
  0x9c   : > { %v283_v19 = vrot.slane %v282_v18, 4 }
  0x9e   : > { %v284_v20 = vadd.f32 %v283_v19, %v282_v18 }
  0xa0   : > { %v285_v21 = vrot.slane %v284_v20, 2 }
  0xa2   : > { %v286_v22 = vadd.f32 %v285_v21, %v284_v20 }
  0xa4   : > { %v287_v23 = vrot.slane %v286_v22, 1 }
  0xa6   : > { %v288_v24 = vadd.f32 %v287_v23, %v286_v22 }
  0xa8   : > { %1184 = vpush %v288_v24 }
  0xd9   : > { %s1185_s15 = spop %1184 }
  0xda   : > { %s290_s16 = smul.f32 0.0009765625, %s1185_s15  ;;  %s1356_s15 = smov 91  }
  0xdc   : > { %v291_v25 = vstv %s290_s16  ;;  %s1357_s16 = smov 90  }
  0xdd   : > { %v292_v26 = vsub.f32 %v251_v6, %v291_v25  ;;  %v293_v27 = vsub.f32 %v252_v7, %v291_v25 }
  0xdf   : > { %v294_v28 = vmul.f32 %v292_v26, %v1449_v5  ;;  %v295_v29 = vmul.f32 %v293_v27, %v1446_v4 }
  0xe1   : > { %v296_v30 = vmul.f32 %v294_v28, %v294_v28  ;;  %v297_v31 = vmul.f32 %v295_v29, %v295_v29 }
  0xe3   : > { %300 = vst [vmem:[#allocation1] ss:$2 sm:$0xff] %v296_v30 }
  0xe4   : > { %302 = vst [vmem:[#allocation1 + $0x10] ss:$2 sm:$0xff] %v297_v31 }
  0xea   : > { %v303_v32 = vld.sshfl [vmem:[#allocation1] sm:$0xff pattern:$0x75316420]  ;;  %v304_v33 = vld.sshfl [vmem:[#allocation1 + $0x8] sm:$0xff pattern:$0x75316420] }
  0xeb   : > { %v305_v34 = vld.sshfl [vmem:[#allocation1 + $0x10] sm:$0xff pattern:$0x75316420]  ;;  %v309_v35 = vsel %vm260_vm0, %v303_v32, 0.0  ;;  %v310_v36 = vsel %vm260_vm0, %v304_v33, 0.0 }
  0xec   : > { %v311_v37 = vadd.f32 %v310_v36, %v309_v35  ;;  %v312_v38 = vsel %vm260_vm0, %v305_v34, 0.0 }
  0xee   : > { %v313_v39 = vadd.f32 %v312_v38, %v311_v37 }
  0xf0   : > { %314 = vadd.xlane.f32.xlu0 %v313_v39 }
 0x163   : > { %v315_v43 = vpop.xlane.xlu0 %314 }
 0x164   : > { %v316_v44 = vrot.slane %v315_v43, 4 }
 0x166   : > { %v317_v45 = vadd.f32 %v316_v44, %v315_v43 }
 0x168   : > { %v318_v46 = vrot.slane %v317_v45, 2 }
 0x16a   : > { %v319_v47 = vadd.f32 %v318_v46, %v317_v45 }
 0x16c   : > { %v320_v48 = vrot.slane %v319_v47, 1 }
 0x16e   : > { %v321_v49 = vadd.f32 %v320_v48, %v319_v47  ;;  %v396_v47 = vlaneseq  ;;  %v366_v48 = vld [vmem:[%s1652_s5] sm:$0xf] }
 0x170   : > { %1186 = vpush %v321_v49  ;;  %v1503_v49 = vand.u32 127, %v396_v47 }
 0x172   : > { %vm398_vm6 = vcmp.lt.s32.totalorder %v1503_v49, 127  ;;  %vm604_vm7 = vcmp.lt.s32.totalorder %v1503_v49, 110  ;;  %vm526_vm8 = vcmp.lt.s32.totalorder %v1503_v49, 126  ;;  %vm682_vm9 = vcmp.lt.s32.totalorder %v1503_v49, 109 }
 0x173   : > { %vm760_vm10 = vcmp.lt.s32.totalorder %v1503_v49, 108  ;;  %vm838_vm11 = vcmp.lt.s32.totalorder %v1503_v49, 92  ;;  %vm916_vm12 = vcmp.lt.s32.totalorder %v1503_v49, 91  ;;  %vm994_vm13 = vcmp.lt.s32.totalorder %v1503_v49, 90  ;;  %v1167_v49 = vld [vmem:[%s1652_s5 + $0x18] sm:$0xf] }
 0x1a1   : > { %s1187_s25 = spop %1186 }
 0x1a2   : > { %s323_s27 = smul.f32 0.0009765625, %s1187_s25  ;;  %s244_s25 = scalar_lea.vmem [#allocation2], %s1182_s20 }
 0x1a4   : > { %s324_s28 = sadd.f32 1e-05, %s323_s27  ;;  %s1190_s27 = smul.u32 24, %s1414_s24 }
 0x1a6   : > { %v325_v50 = vstv %s324_s28 }
 0x1a7   : > { %1282 = vrsqrt.f32 %v325_v50  ;;  %vm332_vm2 = vweird.f32 %v325_v50 }
 0x1ad   : > { %v1283_v51 = vpop.eup %1282 }
 0x1ae   : > { %v327_v52 = vmul.f32 %v1283_v51, %v325_v50  ;;  %vm333_vm1 = vweird.f32 %v1283_v51 }
 0x1af   : > { %vm334_vm3 = vmor %vm332_vm2, %vm333_vm1 }
 0x1b0   : > { %v328_v53 = vmul.f32 %v1283_v51, %v327_v52 }
 0x1b2   : > { %v329_v54 = vmul.f32 0.5, %v328_v53 }
 0x1b4   : > { %v330_v55 = vsub.f32 1.5, %v329_v54 }
 0x1b6   : > { %v331_v56 = vmul.f32 %v1283_v51, %v330_v55 }
 0x1b8   : > { %v335_v57 = vsel %vm334_vm3, %v1283_v51, %v331_v56 }
 0x1b9   : > { %1188 = vpush %v335_v57 }
 0x1ea   : > { %s1189_s8 = spop %1188 }
 0x1eb   : > { %v337_v63 = vstv %s1189_s8 }
 0x1ec   : > { %v338_v1 = vmul.f32 %v337_v63, %v292_v26  ;;  %v339_v2 = vmul.f32 %v337_v63, %v293_v27 }
 0x1ee   : > { %v350_v6 = vmul.f32 %v348_v0, %v338_v1  ;;  %v351_v7 = vmul.f32 %v348_v0, %v339_v2 }
 0x1f0   : > { %v362_v8 = vadd.f32 %v360_v3, %v350_v6  ;;  %v363_v9 = vadd.f32 %v360_v3, %v351_v7 }
 0x1f2   : > { %v1471_v10 = vmul.f32 %v362_v8, %v1449_v5  ;;  %v1474_v11 = vmul.f32 %v363_v9, %v1446_v4 }
 0x1f4   : > { %369 = vst [vmem:[#allocation1] ss:$2 sm:$0xff] %v1471_v10 }
 0x1f5   : > { %371 = vst [vmem:[#allocation1 + $0x10] ss:$2 sm:$0xff] %v1474_v11 }
 0x1fb   : > { %v372_v12 = vld.sshfl [vmem:[#allocation1] sm:$0xff pattern:$0x75316420]  ;;  %v1478_v13 = vld.sshfl [vmem:[#allocation1 + $0x8] sm:$0xff pattern:$0x75316420] }
 0x1fc   : > { %v378_v14 = vpack.c.bf16 %v372_v12, %v372_v12  ;;  %381 = vst [vmem:[#allocation1] ss:$2 sm:$0xff] %v1471_v10  ;;  %v1481_v15 = vld.sshfl [vmem:[#allocation1 + $0x10] sm:$0xff pattern:$0x75316420]  ;;  %v379_v59 = vpack.c.bf16 %v1478_v13, %v1478_v13 }
 0x1fd   : > { %383 = vst [vmem:[#allocation1 + $0x10] ss:$2 sm:$0xff] %v1474_v11  ;;  %v380_v60 = vpack.c.bf16 %v1481_v15, %v1481_v15 }
 0x1fe   : > { %v464_v5 = vsel %vm411_vm4, %v378_v14, 0  ;;  %v467_v2 = vsel %vm411_vm4, %v379_v59, 0  ;;  %v1159_v59 = vld [vmem:[%s1652_s5 + $0x10] sm:$0xf] }
 0x1ff   : > { %479 = vmatpush.bf16.msra.mxu3 %v464_v5  ;;  %v470_v3 = vsel %vm411_vm4, %v380_v60, 0 }
 0x202   : > { %1148 = vmatmul.msk.bf16.vlgmr.msra.gmra.mxu3 %vm407_vm5, %v366_v48 }
 0x203   : > { %v384_v4 = vld.sshfl [vmem:[#allocation1] sm:$0xff pattern:$0x75316420]  ;;  %v385_v16 = vld.sshfl [vmem:[#allocation1 + $0x8] sm:$0xff pattern:$0x75316420] }
 0x204   : > { %v386_v17 = vld.sshfl [vmem:[#allocation1 + $0x10] sm:$0xff pattern:$0x75316420]  ;;  %511 = vst [vmem:[#allocation1] ss:$2 sm:$0xff] %v1471_v10 }
 0x205   : > { %513 = vst [vmem:[#allocation1 + $0x10] ss:$2 sm:$0xff] %v1474_v11  ;;  %v1241_v18 = vpack.i.bf16 %v386_v17, %v384_v4 }
 0x207   : > { %1242 = vrot.lane.b32.xlu2 %v1241_v18, %s1350_s9 }
 0x20b   : > { %v514_v19 = vld.sshfl [vmem:[#allocation1] sm:$0xff pattern:$0x75316420]  ;;  %v515_v20 = vld.sshfl [vmem:[#allocation1 + $0x8] sm:$0xff pattern:$0x75316420] }
 0x20c   : > { %v516_v21 = vld.sshfl [vmem:[#allocation1 + $0x10] sm:$0xff pattern:$0x75316420]  ;;  %v1246_v22 = vpack.i.bf16 %v515_v20, %v514_v19  ;;  %589 = vst [vmem:[#allocation1] ss:$2 sm:$0xff] %v1471_v10 }
 0x20d   : > { %524 = vrot.lane.b32.xlu1 %v516_v21, %s1351_s10  ;;  %591 = vst [vmem:[#allocation1 + $0x10] ss:$2 sm:$0xff] %v1474_v11 }
 0x20e   : > { %1247 = vrot.lane.b32.xlu0 %v1246_v22, %s1351_s10  ;;  %s1077_s10 = sshll.u32 %s244_s25, 4  ;;  %s1078_s10 = int_to_ptr.vmem [resolvable:$true] %s1077_s10 }
 0x20f   : > { %392 = vrot.lane.b32.xlu2 %v385_v16, %s1350_s9  ;;  %s1075_s9 = scalar_lea.hbm %s1653_s6, %s1190_s27 }
 0x213   : > { %v592_v23 = vld.sshfl [vmem:[#allocation1] sm:$0xff pattern:$0x75316420]  ;;  %v593_v24 = vld.sshfl [vmem:[#allocation1 + $0x8] sm:$0xff pattern:$0x75316420] }
 0x214   : > { %v594_v25 = vld.sshfl [vmem:[#allocation1 + $0x10] sm:$0xff pattern:$0x75316420]  ;;  %667 = vst [vmem:[#allocation1] ss:$2 sm:$0xff] %v1471_v10 }
 0x215   : > { %598 = vrot.lane.b32.xlu1 %v592_v23, %s1352_s11  ;;  %669 = vst [vmem:[#allocation1 + $0x10] ss:$2 sm:$0xff] %v1474_v11  ;;  %v1251_v26 = vpack.i.bf16 %v594_v25, %v593_v24 }
 0x217   : > { %1252 = vrot.lane.b32.xlu2 %v1251_v26, %s1352_s11  ;;  %s1079_s11 = sshll.u32 %s1075_s9, 4  ;;  %s1080_s11 = int_to_ptr.hbm [resolvable:$true] %s1079_s11 }
 0x218   : > { %s1298_s24 = sshra.s32 %s1080_s11, 4  ;;  %s1299_s24 = int_to_ptr.hbm [resolvable:$true] %s1298_s24 }
 0x219   : > { %p1305_p0 = scmp.lt.s32.totalorder %s1299_s24, %s1653_s6 }
 0x21b   : > { %v671_v27 = vld.sshfl [vmem:[#allocation1 + $0x8] sm:$0xff pattern:$0x75316420]  ;;  %v670_v28 = vld.sshfl [vmem:[#allocation1] sm:$0xff pattern:$0x75316420] }
 0x21c   : > { %v672_v29 = vld.sshfl [vmem:[#allocation1 + $0x10] sm:$0xff pattern:$0x75316420]  ;;  %745 = vst [vmem:[#allocation1] ss:$2 sm:$0xff] %v1471_v10 }
 0x21d   : > { %678 = vrot.lane.b32.xlu1 %v671_v27, %s1353_s12  ;;  %747 = vst [vmem:[#allocation1 + $0x10] ss:$2 sm:$0xff] %v1474_v11  ;;  %v1256_v30 = vpack.i.bf16 %v672_v29, %v670_v28 }
 0x21f   : > { %1257 = vrot.lane.b32.xlu2 %v1256_v30, %s1353_s12  ;;  %s1064_s12 = scalar_lea.sflag [#allocation3], %s242_s19 }
 0x223   : > { %v748_v31 = vld.sshfl [vmem:[#allocation1] sm:$0xff pattern:$0x75316420]  ;;  %v749_v32 = vld.sshfl [vmem:[#allocation1 + $0x8] sm:$0xff pattern:$0x75316420] }
 0x224   : > { %v750_v33 = vld.sshfl [vmem:[#allocation1 + $0x10] sm:$0xff pattern:$0x75316420]  ;;  %v1261_v34 = vpack.i.bf16 %v749_v32, %v748_v31  ;;  %823 = vst [vmem:[#allocation1] ss:$2 sm:$0xff] %v1471_v10 }
 0x225   : > { %825 = vst [vmem:[#allocation1 + $0x10] ss:$2 sm:$0xff] %v1474_v11  ;;  %758 = vrot.lane.b32.xlu1 %v750_v33, %s1354_s13  ;;  %v1151_v33 = vld [vmem:[%s1652_s5 + $0x8] sm:$0xf] }
 0x227   : > { %1262 = vrot.lane.b32.xlu2 %v1261_v34, %s1354_s13  ;;  %s1300_s13 = scalar_lea.hbm %s1299_s24, 24 }
 0x228   : > { %p1301_p11 = scmp.ne.s32.totalorder %s1299_s24, %s1300_s13 }
 0x22a   : > { %p1302_p12 = pnand %p1301_p11, %p1431_p5 }
 0x22b   : > { %v826_v35 = vld.sshfl [vmem:[#allocation1] sm:$0xff pattern:$0x75316420]  ;;  %v827_v36 = vld.sshfl [vmem:[#allocation1 + $0x8] sm:$0xff pattern:$0x75316420] }
 0x22c   : > { %v828_v37 = vld.sshfl [vmem:[#allocation1 + $0x10] sm:$0xff pattern:$0x75316420]  ;;  %v1266_v38 = vpack.i.bf16 %v827_v36, %v826_v35  ;;  %901 = vst [vmem:[#allocation1] ss:$2 sm:$0xff] %v1471_v10  ;;  %p1303_p13 = pneg %p1302_p12 }
 0x22d   : > { %903 = vst [vmem:[#allocation1 + $0x10] ss:$2 sm:$0xff] %v1474_v11 }
 0x22e   : > { %1267 = vrot.lane.b32.xlu0 %v1266_v38, %s1355_s14 }
 0x22f   : > { %836 = vrot.lane.b32.xlu2 %v828_v37, %s1355_s14 }
 0x233   : > { %v904_v39 = vld.sshfl [vmem:[#allocation1] sm:$0xff pattern:$0x75316420]  ;;  %v905_v40 = vld.sshfl [vmem:[#allocation1 + $0x8] sm:$0xff pattern:$0x75316420] }
 0x234   : > { %910 = vrot.lane.b32.xlu1 %v904_v39, %s1356_s15  ;;  %v906_v41 = vld.sshfl [vmem:[#allocation1 + $0x10] sm:$0xff pattern:$0x75316420]  ;;  %979 = vst [vmem:[#allocation1] ss:$2 sm:$0xff] %v1471_v10 }
 0x235   : > { %v1271_v42 = vpack.i.bf16 %v906_v41, %v905_v40  ;;  %981 = vst [vmem:[#allocation1 + $0x10] ss:$2 sm:$0xff] %v1474_v11 }
 0x237   : > { %1272 = vrot.lane.b32.xlu0 %v1271_v42, %s1356_s15 }
 0x23b   : > { %v982_v43 = vld.sshfl [vmem:[#allocation1] sm:$0xff pattern:$0x75316420]  ;;  %v983_v46 = vld.sshfl [vmem:[#allocation1 + $0x8] sm:$0xff pattern:$0x75316420] }
 0x23c   : > { %v984_v44 = vld.sshfl [vmem:[#allocation1 + $0x10] sm:$0xff pattern:$0x75316420] }
 0x23d   : > { %v1276_v45 = vpack.i.bf16 %v984_v44, %v982_v43  ;;  %v1155_v43 = vld [vmem:[%s1652_s5 + $0xc] sm:$0xf] }
 0x23f   : > { %990 = vrot.lane.b32.xlu0 %v983_v46, %s1357_s16  ;;  %1277 = vrot.lane.b32.xlu2 %v1276_v45, %s1357_s16  ;;  %s1304_s16 = scalar_lea.hbm %s1653_s6, 48 }
 0x240   : > { %p1306_p1 = scmp.lt.s32.totalorder %s1304_s16, %s1300_s13 }
 0x242   : > { %p1307_p2 = por %p1306_p1, %p1305_p0 }
 0x244   : > { %p1308_p3 = pnand %p1307_p2, %p1303_p13 }
 0x261   : > { %v1243_v50 = vpop.permute.xlu2 %1242 }
 0x262   : > { %v1245_v51 = vunpack.i.h.bf16 %v1243_v50  ;;  %v1244_v52 = vunpack.i.l.bf16 %v1243_v50 }
 0x264   : > { %v401_v53 = vsel %vm398_vm6, %v1245_v51, %v1244_v52 }
 0x265   : > { %v406_v54 = vpack.c.bf16 %v401_v53, %v401_v53 }
 0x267   : > { %v419_v55 = vsel %vm411_vm4, %v406_v54, 0 }
 0x268   : > { %454 = vmatpush.bf16.msra.mxu2 %v419_v55 }
 0x269   : > { %v393_v56 = vpop.permute.xlu2 %392 }
 0x26a   : > { %v399_v57 = vsel %vm398_vm6, %v393_v56, %v1245_v51  ;;  %v400_v58 = vsel %vm398_vm6, %v1244_v52, %v393_v56 }
 0x26b   : > { %v404_v62 = vpack.c.bf16 %v400_v58, %v400_v58  ;;  %v405_v63 = vpack.c.bf16 %v399_v57, %v399_v57  ;;  %1147 = vmatmul.msk.bf16.vlgmr.msra.gmra.mxu2 %vm407_vm5, %v1144_v61 }
 0x26d   : > { %v413_v0 = vsel %vm411_vm4, %v404_v62, 0  ;;  %v416_v1 = vsel %vm411_vm4, %v405_v63, 0 }
 0x26e   : > { %428 = vmatpush.bf16.msra.mxu0 %v413_v0  ;;  %441 = vmatpush.bf16.msra.mxu1 %v416_v1 }
 0x271   : > { %1145 = vmatmul.msk.bf16.vlgmr.msra.gmra.mxu0 %vm407_vm5, %v1144_v61  ;;  %v1253_v6 = vpop.permute.xlu2 %1252  ;;  %1146 = vmatmul.msk.bf16.vlgmr.msra.gmra.mxu1 %vm407_vm5, %v1144_v61 }
 0x272   : > { %492 = vmatpush.bf16.msrb.mxu0 %v467_v2  ;;  %505 = vmatpush.bf16.msrb.mxu1 %v470_v3  ;;  %v1255_v8 = vunpack.i.h.bf16 %v1253_v6  ;;  %v1254_v9 = vunpack.i.l.bf16 %v1253_v6 }
 0x274   : > { %v605_v13 = vsel %vm604_vm7, %v1254_v9, %v1255_v8 }
 0x275   : > { %v611_v18 = vpack.c.bf16 %v605_v13, %v605_v13 }
 0x277   : > { %v620_v32 = vsel %vm411_vm4, %v611_v18, 0 }
 0x279   : > { %v1258_v7 = vpop.permute.xlu2 %1257 }
 0x27a   : > { %v1260_v10 = vunpack.i.h.bf16 %v1258_v7  ;;  %v1259_v11 = vunpack.i.l.bf16 %v1258_v7 }
 0x27c   : > { %v685_v22 = vsel %vm682_vm9, %v1260_v10, %v1259_v11 }
 0x27d   : > { %v690_v30 = vpack.c.bf16 %v685_v22, %v685_v22 }
 0x27f   : > { %v525_v12 = vpop.permute.xlu1 %524  ;;  %v701_v39 = vsel %vm411_vm4, %v690_v30, 0 }
 0x280   : > { %v1248_v14 = vpop.permute.xlu0 %1247 }
 0x281   : > { %1149 = vmatmul.msk.bf16.vlgmr.msrb.gmra.mxu0 %vm407_vm5, %v366_v48  ;;  %v1250_v15 = vunpack.i.h.bf16 %v1248_v14  ;;  %v1249_v5 = vunpack.i.l.bf16 %v1248_v14  ;;  %v1263_v4 = vpop.permute.xlu2 %1262  ;;  %1150 = vmatmul.msk.bf16.vlgmr.msrb.gmra.mxu1 %vm407_vm5, %v366_v48 }
 0x282   : > { %v1265_v16 = vunpack.i.h.bf16 %v1263_v4  ;;  %v1264_v17 = vunpack.i.l.bf16 %v1263_v4 }
 0x283   : > { %v528_v19 = vsel %vm526_vm8, %v1249_v5, %v1250_v15  ;;  %v527_v20 = vsel %vm526_vm8, %v1250_v15, %v525_v12  ;;  %v529_v21 = vsel %vm526_vm8, %v525_v12, %v1249_v5 }
 0x284   : > { %v532_v23 = vpack.c.bf16 %v528_v19, %v528_v19  ;;  %v533_v24 = vpack.c.bf16 %v527_v20, %v527_v20  ;;  %v534_v25 = vpack.c.bf16 %v529_v21, %v529_v21  ;;  %v762_v26 = vsel %vm760_vm10, %v1264_v17, %v1265_v16 }
 0x285   : > { %v766_v36 = vpack.c.bf16 %v762_v26, %v762_v26 }
 0x286   : > { %v539_v27 = vsel %vm411_vm4, %v532_v23, 0  ;;  %v542_v28 = vsel %vm411_vm4, %v533_v24, 0  ;;  %v545_v29 = vsel %vm411_vm4, %v534_v25, 0 }
 0x287   : > { %v599_v31 = vpop.permute.xlu1 %598  ;;  %554 = vmatpush.bf16.msrb.mxu2 %v539_v27  ;;  %567 = vmatpush.bf16.msrb.mxu3 %v542_v28  ;;  %v773_v42 = vsel %vm411_vm4, %v766_v36, 0  ;;  %v1171_v36 = vld [vmem:[%s1652_s5 + $0x1c] sm:$0xf] }
 0x288   : > { %v606_v34 = vsel %vm604_vm7, %v599_v31, %v1254_v9  ;;  %v607_v35 = vsel %vm604_vm7, %v1255_v8, %v599_v31  ;;  %580 = vmatpush.bf16.msra.mxu0 %v545_v29 }
 0x289   : > { %v610_v37 = vpack.c.bf16 %v606_v34, %v606_v34  ;;  %v612_v38 = vpack.c.bf16 %v607_v35, %v607_v35  ;;  %v837_v63 = vpop.permute.xlu2 %836 }
 0x28a   : > { %1152 = vmatmul.msk.bf16.vlgmr.msrb.gmra.mxu2 %vm407_vm5, %v1151_v33  ;;  %1153 = vmatmul.msk.bf16.vlgmr.msrb.gmra.mxu3 %vm407_vm5, %v1151_v33 }
 0x28b   : > { %645 = vmatpush.bf16.msra.mxu2 %v620_v32  ;;  %v617_v40 = vsel %vm411_vm4, %v610_v37, 0  ;;  %v623_v41 = vsel %vm411_vm4, %v612_v38, 0  ;;  %v1175_v37 = vld [vmem:[%s1652_s5 + $0x20] sm:$0xf]  ;;  %v481_v38 = vpop.f32.mrf.mxu3 }
 0x28c   : > { %632 = vmatpush.bf16.msra.mxu1 %v617_v40  ;;  %658 = vmatpush.bf16.msra.mxu3 %v623_v41 }
 0x28f   : > { %736 = vmatpush.bf16.msrb.mxu2 %v701_v39  ;;  %v679_v44 = vpop.permute.xlu1 %678 }
 0x290   : > { %788 = vmatpush.bf16.msrb.mxu3 %v773_v42  ;;  %v683_v45 = vsel %vm682_vm9, %v679_v44, %v1260_v10  ;;  %v684_v46 = vsel %vm682_vm9, %v1259_v11, %v679_v44  ;;  %v1163_v11 = vld [vmem:[%s1652_s5 + $0x14] sm:$0xf] }
 0x291   : > { %v688_v47 = vpack.c.bf16 %v684_v46, %v684_v46  ;;  %v689_v48 = vpack.c.bf16 %v683_v45, %v683_v45  ;;  %1154 = vmatmul.msk.bf16.vlgmr.msra.gmra.mxu0 %vm407_vm5, %v1151_v33  ;;  %1156 = vmatmul.msk.bf16.vlgmr.msra.gmra.mxu1 %vm407_vm5, %v1155_v43 }
 0x293   : > { %v695_v50 = vsel %vm411_vm4, %v688_v47, 0  ;;  %v698_v51 = vsel %vm411_vm4, %v689_v48, 0  ;;  %v483_v39 = vpop.f32.mrf.mxu3 }
 0x294   : > { %710 = vmatpush.bf16.msrb.mxu0 %v695_v50  ;;  %723 = vmatpush.bf16.msrb.mxu1 %v698_v51 }
 0x297   : > { %v759_v52 = vpop.permute.xlu1 %758 }
 0x298   : > { %v761_v53 = vsel %vm760_vm10, %v1265_v16, %v759_v52  ;;  %v763_v54 = vsel %vm760_vm10, %v759_v52, %v1264_v17 }
 0x299   : > { %v767_v55 = vpack.c.bf16 %v761_v53, %v761_v53  ;;  %v768_v56 = vpack.c.bf16 %v763_v54, %v763_v54  ;;  %v1278_v15 = vpop.permute.xlu2 %1277 }
 0x29a   : > { %1157 = vmatmul.msk.bf16.vlgmr.msra.gmra.mxu2 %vm407_vm5, %v1155_v43  ;;  %1158 = vmatmul.msk.bf16.vlgmr.msra.gmra.mxu3 %vm407_vm5, %v1155_v43  ;;  %v1280_v21 = vunpack.i.h.bf16 %v1278_v15  ;;  %v1279_v22 = vunpack.i.l.bf16 %v1278_v15 }
 0x29b   : > { %v776_v57 = vsel %vm411_vm4, %v767_v55, 0  ;;  %v779_v58 = vsel %vm411_vm4, %v768_v56, 0 }
 0x29c   : > { %801 = vmatpush.bf16.msra.mxu0 %v776_v57  ;;  %814 = vmatpush.bf16.msra.mxu1 %v779_v58  ;;  %v997_v31 = vsel %vm994_vm13, %v1280_v21, %v1279_v22 }
 0x29d   : > { %v1002_v34 = vpack.c.bf16 %v997_v31, %v997_v31 }
 0x29f   : > { %v1013_v35 = vsel %vm411_vm4, %v1002_v34, 0 }
 0x2a0   : > { %v1268_v60 = vpop.permute.xlu0 %1267 }
 0x2a1   : > { %1160 = vmatmul.msk.bf16.vlgmr.msrb.gmra.mxu0 %vm407_vm5, %v1159_v59  ;;  %v1270_v61 = vunpack.i.h.bf16 %v1268_v60  ;;  %v1269_v62 = vunpack.i.l.bf16 %v1268_v60  ;;  %1161 = vmatmul.msk.bf16.vlgmr.msrb.gmra.mxu1 %vm407_vm5, %v1159_v59 }
 0x2a3   : > { %v840_v0 = vsel %vm838_vm11, %v1269_v62, %v1270_v61  ;;  %v839_v1 = vsel %vm838_vm11, %v1270_v61, %v837_v63  ;;  %v841_v2 = vsel %vm838_vm11, %v837_v63, %v1269_v62 }
 0x2a4   : > { %v844_v3 = vpack.c.bf16 %v840_v0, %v840_v0  ;;  %v845_v6 = vpack.c.bf16 %v839_v1, %v839_v1  ;;  %v846_v7 = vpack.c.bf16 %v841_v2, %v841_v2 }
 0x2a6   : > { %v851_v8 = vsel %vm411_vm4, %v844_v3, 0  ;;  %v854_v9 = vsel %vm411_vm4, %v845_v6, 0  ;;  %v857_v10 = vsel %vm411_vm4, %v846_v7, 0  ;;  %v911_v5 = vpop.permute.xlu1 %910 }
 0x2a7   : > { %866 = vmatpush.bf16.msra.mxu2 %v851_v8  ;;  %879 = vmatpush.bf16.msra.mxu3 %v854_v9 }
 0x2a8   : > { %892 = vmatpush.bf16.msrb.mxu0 %v857_v10 }
 0x2a9   : > { %v1273_v12 = vpop.permute.xlu0 %1272 }
 0x2aa   : > { %v1275_v13 = vunpack.i.h.bf16 %v1273_v12  ;;  %v1274_v14 = vunpack.i.l.bf16 %v1273_v12  ;;  %1162 = vmatmul.msk.bf16.vlgmr.msrb.gmra.mxu2 %vm407_vm5, %v1159_v59  ;;  %1164 = vmatmul.msk.bf16.vlgmr.msrb.gmra.mxu3 %vm407_vm5, %v1163_v11 }
 0x2ac   : > { %v918_v4 = vsel %vm916_vm12, %v911_v5, %v1274_v14  ;;  %v917_v16 = vsel %vm916_vm12, %v1274_v14, %v1275_v13  ;;  %v919_v17 = vsel %vm916_vm12, %v1275_v13, %v911_v5 }
 0x2ad   : > { %v922_v18 = vpack.c.bf16 %v918_v4, %v918_v4  ;;  %v923_v19 = vpack.c.bf16 %v917_v16, %v917_v16  ;;  %v924_v20 = vpack.c.bf16 %v919_v17, %v919_v17 }
 0x2af   : > { %v929_v23 = vsel %vm411_vm4, %v922_v18, 0  ;;  %v932_v24 = vsel %vm411_vm4, %v923_v19, 0  ;;  %v935_v25 = vsel %vm411_vm4, %v924_v20, 0 }
 0x2b0   : > { %944 = vmatpush.bf16.msrb.mxu1 %v929_v23  ;;  %957 = vmatpush.bf16.msrb.mxu2 %v932_v24 }
 0x2b1   : > { %970 = vmatpush.bf16.msrb.mxu3 %v935_v25  ;;  %1165 = vmatmul.msk.bf16.vlgmr.msra.gmra.mxu0 %vm407_vm5, %v1163_v11  ;;  %v991_v26 = vpop.permute.xlu0 %990 }
 0x2b2   : > { %v995_v27 = vsel %vm994_vm13, %v991_v26, %v1280_v21  ;;  %v996_v28 = vsel %vm994_vm13, %v1279_v22, %v991_v26  ;;  %1166 = vmatmul.msk.bf16.vlgmr.msra.gmra.mxu1 %vm407_vm5, %v1163_v11 }
 0x2b3   : > { %v1000_v29 = vpack.c.bf16 %v996_v28, %v996_v28  ;;  %v1001_v30 = vpack.c.bf16 %v995_v27, %v995_v27 }
 0x2b5   : > { %v1007_v32 = vsel %vm411_vm4, %v1000_v29, 0  ;;  %v1010_v33 = vsel %vm411_vm4, %v1001_v30, 0 }
 0x2b6   : > { %1022 = vmatpush.bf16.msra.mxu0 %v1007_v32  ;;  %1035 = vmatpush.bf16.msra.mxu1 %v1010_v33 }
 0x2ba   : > { %1168 = vmatmul.msk.bf16.vlgmr.msra.gmra.mxu2 %vm407_vm5, %v1167_v49  ;;  %1169 = vmatmul.msk.bf16.vlgmr.msra.gmra.mxu3 %vm407_vm5, %v1167_v49 }
 0x2bb   : > { %1048 = vmatpush.bf16.msra.mxu2 %v1013_v35 }
 0x2c1   : > { %1170 = vmatmul.msk.bf16.vlgmr.msrb.gmra.mxu0 %vm407_vm5, %v1167_v49 }
 0x2c2   : > { %1172 = vmatmul.msk.bf16.vlgmr.msrb.gmra.mxu1 %vm407_vm5, %v1171_v36 }
 0x2ca   : > { %1173 = vmatmul.msk.bf16.vlgmr.msrb.gmra.mxu2 %vm407_vm5, %v1171_v36  ;;  %1174 = vmatmul.msk.bf16.vlgmr.msrb.gmra.mxu3 %vm407_vm5, %v1171_v36 }
 0x2d1   : > { %1176 = vmatmul.msk.bf16.vlgmr.msra.gmra.mxu0 %vm407_vm5, %v1175_v37 }
 0x2d2   : > { %1177 = vmatmul.msk.bf16.vlgmr.msra.gmra.mxu1 %vm407_vm5, %v1175_v37 }
 0x2da   : > { %1178 = vmatmul.msk.bf16.vlgmr.msra.gmra.mxu2 %vm407_vm5, %v1175_v37 }
 0x2ee   : > { %v430_v40 = vpop.f32.mrf.mxu0  ;;  %v443_v41 = vpop.f32.mrf.mxu1 }
 0x2ef   : > { %v456_v42 = vpop.f32.mrf.mxu2  ;;  %v482_v43 = vadd.f32 %v481_v38, %v430_v40 }
 0x2f6   : > { %v432_v44 = vpop.f32.mrf.mxu0  ;;  %v445_v45 = vpop.f32.mrf.mxu1 }
 0x2f7   : > { %v458_v46 = vpop.f32.mrf.mxu2 }
 0x2fe   : > { %v494_v47 = vpop.f32.mrf.mxu0  ;;  %v507_v48 = vpop.f32.mrf.mxu1 }
 0x2ff   : > { %v495_v50 = vadd.f32 %v494_v47, %v443_v41  ;;  %v508_v51 = vadd.f32 %v507_v48, %v456_v42 }
 0x306   : > { %v496_v52 = vpop.f32.mrf.mxu0  ;;  %v509_v53 = vpop.f32.mrf.mxu1 }
 0x30d   : > { %v556_v54 = vpop.f32.mrf.mxu2  ;;  %v569_v55 = vpop.f32.mrf.mxu3 }
 0x30e   : > { %v582_v56 = vpop.f32.mrf.mxu0  ;;  %v634_v57 = vpop.f32.mrf.mxu1  ;;  %v586_v18 = vadd.f32 %v556_v54, %v482_v43  ;;  %v587_v20 = vadd.f32 %v569_v55, %v495_v50 }
 0x30f   : > { %v588_v58 = vadd.f32 %v582_v56, %v508_v51 }
 0x310   : > { %v664_v21 = vadd.f32 %v634_v57, %v586_v18 }
 0x315   : > { %v558_v59 = vpop.f32.mrf.mxu2  ;;  %v571_v60 = vpop.f32.mrf.mxu3 }
 0x316   : > { %v584_v61 = vpop.f32.mrf.mxu0  ;;  %v636_v62 = vpop.f32.mrf.mxu1 }
 0x31d   : > { %v647_v63 = vpop.f32.mrf.mxu2  ;;  %v660_v0 = vpop.f32.mrf.mxu3 }
 0x31e   : > { %v712_v1 = vpop.f32.mrf.mxu0  ;;  %v725_v2 = vpop.f32.mrf.mxu1  ;;  %v665_v22 = vadd.f32 %v647_v63, %v587_v20  ;;  %v666_v41 = vadd.f32 %v660_v0, %v588_v58 }
 0x31f   : > { %v742_v23 = vadd.f32 %v712_v1, %v664_v21 }
 0x320   : > { %v743_v29 = vadd.f32 %v725_v2, %v665_v22 }
 0x325   : > { %v649_v3 = vpop.f32.mrf.mxu2  ;;  %v662_v6 = vpop.f32.mrf.mxu3 }
 0x326   : > { %v714_v7 = vpop.f32.mrf.mxu0  ;;  %v727_v8 = vpop.f32.mrf.mxu1 }
 0x32d   : > { %v738_v9 = vpop.f32.mrf.mxu2  ;;  %v790_v10 = vpop.f32.mrf.mxu3 }
 0x32e   : > { %v803_v11 = vpop.f32.mrf.mxu0  ;;  %v820_v27 = vadd.f32 %v790_v10, %v742_v23  ;;  %v744_v43 = vadd.f32 %v738_v9, %v666_v41 }
 0x32f   : > { %v816_v12 = vpop.f32.mrf.mxu1  ;;  %v821_v31 = vadd.f32 %v803_v11, %v743_v29 }
 0x330   : > { %v822_v48 = vadd.f32 %v816_v12, %v744_v43 }
 0x335   : > { %v740_v13 = vpop.f32.mrf.mxu2  ;;  %v792_v14 = vpop.f32.mrf.mxu3 }
 0x336   : > { %v805_v15 = vpop.f32.mrf.mxu0 }
 0x337   : > { %v818_v5 = vpop.f32.mrf.mxu1 }
 0x33d   : > { %v868_v4 = vpop.f32.mrf.mxu2  ;;  %v881_v16 = vpop.f32.mrf.mxu3 }
 0x33e   : > { %v894_v17 = vpop.f32.mrf.mxu0  ;;  %v898_v30 = vadd.f32 %v868_v4, %v820_v27  ;;  %v899_v32 = vadd.f32 %v881_v16, %v821_v31 }
 0x33f   : > { %v946_v19 = vpop.f32.mrf.mxu1  ;;  %v900_v50 = vadd.f32 %v894_v17, %v822_v48 }
 0x340   : > { %v976_v33 = vadd.f32 %v946_v19, %v898_v30 }
 0x345   : > { %v870_v24 = vpop.f32.mrf.mxu2  ;;  %v883_v25 = vpop.f32.mrf.mxu3 }
 0x346   : > { %v896_v26 = vpop.f32.mrf.mxu0 }
 0x347   : > { %v948_v28 = vpop.f32.mrf.mxu1 }
 0x34d   : > { %v959_v34 = vpop.f32.mrf.mxu2  ;;  %v972_v49 = vpop.f32.mrf.mxu3 }
 0x34e   : > { %v977_v35 = vadd.f32 %v959_v34, %v899_v32  ;;  %v1024_v36 = vpop.f32.mrf.mxu0  ;;  %v978_v51 = vadd.f32 %v972_v49, %v900_v50 }
 0x34f   : > { %v1054_v37 = vadd.f32 %v1024_v36, %v976_v33  ;;  %v1037_v38 = vpop.f32.mrf.mxu1 }
 0x350   : > { %v1055_v39 = vadd.f32 %v1037_v38, %v977_v35 }
 0x351   : > { %v1057_v40 = vmax.f32 %v1054_v37, 0.0 }
 0x352   : > { %v1058_v42 = vmax.f32 %v1055_v39, 0.0 }
 0x353   : > { %1060 = vst [vmem:[%s244_s25] sm:$0xff] %v1057_v40 }
 0x354   : > { %1061 = vst [vmem:[%s244_s25 + $0x8] sm:$0xff] %v1058_v42 }
 0x355   : > { %v961_v44 = vpop.f32.mrf.mxu2  ;;  %v974_v45 = vpop.f32.mrf.mxu3 }
 0x356   : > { %v1026_v46 = vpop.f32.mrf.mxu0 }
 0x357   : > { %v1039_v47 = vpop.f32.mrf.mxu1 }
 0x35d   : > { %v1050_v52 = vpop.f32.mrf.mxu2 }
 0x35e   : > { %v1056_v53 = vadd.f32 %v1050_v52, %v978_v51 }
 0x360   : > { %v1059_v54 = vmax.f32 %v1056_v53, 0.0 }
 0x362   : > { %1062 = vst [vmem:[%s244_s25 + $0x10] sm:$0xff] %v1059_v54 }
 0x363   : > { %1311 = shalt.err (!%p1308_p3)
}
 0x364   : > { %1191 = dma.vmem_to_hbm [thread:$0]  (%p1431_p5), %s1078_s10, 384, %s1080_s11, %s1064_s12  }
 0x365   : > { %v1052_v55 = vpop.f32.mrf.mxu2 }
 0x366 PF: > { %p1197_p4 = scmp.ge.s32.totalorder %s1346_s2, 2  ;;  %s1091_s19 = sand.u32 1, %s1334_s21  }
 0x367   : > { %s1092_s20 = scalar_lea.sflag [#allocation3], %s1091_s19 }
 0x368   : > { %p1194_p7 = pnand %p1197_p4, %p1435_p6 }
 0x36a   : > { %p1195_p8 = pneg %p1194_p7 }
 0x36c   : > { %1329 = dma.done.wait (%p1195_p8), %s1092_s20, 384  }
 0x36d   : > { %1331 = vsyncadd (%p1195_p8), %s1092_s20, 4294966912  ;;  %p16_p9 = scmp.ge.s32.totalorder %s1418_s26, 4   ;;  %s1656_s21 = smov %s1338_s22 }
 0x36e   : > { %s1657_s22 = smov %s1342_s23  ;;  %s1658_s23 = smov %s1429_s29 }
 0x36f   : > { %s1659_s2 = smov %s1418_s26  ;;  %18 = sbr.rel (!%p16_p9) target bundleno = 3 (0x3), region = 98 }
 0x374   :  { %1098 = vsyncpa [#allocation3], 1 }
 0x375   :  { %1100 = vsyncpa [#allocation3 + $0x1], 1 }

</bundles_post_ra>
